<compile_context>
chip_gen: v7x
topology: tpu7x:2x2x1
jax: 0.10.0
libtpu: 0.0.40
codegen_flags: <defaults>
</compile_context>

<pallas_src>
import functools
import math

import jax
import jax.numpy as jnp
from jax.experimental import pallas as pl
from jax.experimental.pallas import tpu as pltpu

BF16 = jnp.bfloat16
_VMEM_LIMIT = 48 * 1024 * 1024   # raised scoped-VMEM limit; fits v5e/v6e (128 MiB) and v7x (64 MiB)


def _pick_tile(dim, candidates):
    """Largest candidate tile that divides `dim`, else the full dim (always legal)."""
    for c in candidates:
        if dim % c == 0:
            return c
    return dim


_ROW_TILES = (512, 256, 128, 64, 32, 16, 8)
_COL_TILES = (1024, 512, 256, 128)
_K_TILES = (512, 256, 128)
_MLP_ROW_TILES = (256, 128, 64, 32, 16, 8)   # keep glu_mlp / ff_block footprint < 32 MiB
_MLP_I_TILES = (256, 128)
_ATTN_TILES = (512, 256, 128)


# ---------------------------------------------------------------------------
# LayerNorm row statistics (only used for the cross-attention to_q prologue)
# ---------------------------------------------------------------------------

def _ln_stats_kernel(x_ref, mu_ref, rstd_ref, *, eps):
    x = x_ref[...].astype(jnp.float32)
    mu = jnp.mean(x, axis=-1, keepdims=True)
    var = jnp.mean((x - mu) ** 2, axis=-1, keepdims=True)
    mu_ref[...] = mu
    rstd_ref[...] = jax.lax.rsqrt(var + eps)


def ln_stats(x, eps=1e-5):
    n, d = x.shape
    tm = _pick_tile(n, _MLP_ROW_TILES)
    return pl.pallas_call(
        functools.partial(_ln_stats_kernel, eps=eps),
        out_shape=(jax.ShapeDtypeStruct((n, 1), jnp.float32),
                   jax.ShapeDtypeStruct((n, 1), jnp.float32)),
        grid=(n // tm,),
        in_specs=[pl.BlockSpec((tm, d), lambda i: (i, 0))],
        out_specs=(pl.BlockSpec((tm, 1), lambda i: (i, 0)),
                   pl.BlockSpec((tm, 1), lambda i: (i, 0))),
        compiler_params=pltpu.CompilerParams(dimension_semantics=("parallel",)),
    )(x)


# ---------------------------------------------------------------------------
# Fused tiled matmul:
#   out = [RMSNorm- or LN-prologue](x) @ w   [* gate] [+ residual]
#   x: (N, K) bf16, w: (K, Dout) bf16 (already [Din, Dout]).
# RMSNorm fusion: accumulate sum(x^2) over K tiles, apply rsqrt in the epilogue.
# ---------------------------------------------------------------------------

def _fused_matmul_kernel(*refs, nk, kdim, rms_eps, has_rms, has_shift, has_xscale,
                         has_colscale, has_colbias, has_gate, has_residual):
    it = iter(refs)
    x_ref = next(it)
    w_ref = next(it)
    shift_ref = next(it) if has_shift else None
    xscale_ref = next(it) if has_xscale else None
    colscale_ref = next(it) if has_colscale else None
    colbias_ref = next(it) if has_colbias else None
    gate_ref = next(it) if has_gate else None
    res_ref = next(it) if has_residual else None
    o_ref = next(it)
    acc_ref = next(it)
    ssq_ref = next(it) if has_rms else None

    k = pl.program_id(2)

    @pl.when(k == 0)
    def _():
        acc_ref[...] = jnp.zeros_like(acc_ref)
        if has_rms:
            ssq_ref[...] = jnp.zeros_like(ssq_ref)

    x = x_ref[...]
    if has_rms:
        xf32 = x.astype(jnp.float32)
        ssq_ref[...] += jnp.sum(xf32 * xf32, axis=-1, keepdims=True)
    if has_shift or has_xscale or has_colscale or has_colbias:
        xf = x.astype(jnp.float32)
        if has_shift:
            xf = xf - shift_ref[...]
        if has_xscale:
            xf = xf * xscale_ref[...]
        if has_colscale:
            xf = xf * colscale_ref[...].astype(jnp.float32)
        if has_colbias:
            xf = xf + colbias_ref[...].astype(jnp.float32)
        x = xf.astype(x_ref.dtype)

    acc_ref[...] += jnp.dot(x, w_ref[...], preferred_element_type=jnp.float32)

    @pl.when(k == nk - 1)
    def _():
        out = acc_ref[...]
        if has_rms:
            out = out * jax.lax.rsqrt(ssq_ref[...] * (1.0 / kdim) + rms_eps)
        if has_gate:
            out = out * gate_ref[0]
        if has_residual:
            out = out + res_ref[...].astype(jnp.float32)
        o_ref[...] = out.astype(o_ref.dtype)


def fused_matmul(x, w, *, rms_gamma=None, rms_eps=1e-6, x_shift=None, x_scale=None,
                 col_scale=None, col_bias=None, gate=None, residual=None,
                 out_dtype=None):
    n, kdim = x.shape
    dout = w.shape[1]
    out_dtype = out_dtype or x.dtype
    tm = _pick_tile(n, _ROW_TILES)
    tn = _pick_tile(dout, _COL_TILES)
    tk = _pick_tile(kdim, _K_TILES)
    nk = kdim // tk
    has_rms = rms_gamma is not None
    if has_rms:
        col_scale = rms_gamma

    inputs = [x, w]
    in_specs = [pl.BlockSpec((tm, tk), lambda i, j, k: (i, k)),
                pl.BlockSpec((tk, tn), lambda i, j, k: (k, j))]
    if x_shift is not None:
        inputs.append(x_shift)
        in_specs.append(pl.BlockSpec((tm, 1), lambda i, j, k: (i, 0)))
    if x_scale is not None:
        inputs.append(x_scale)
        in_specs.append(pl.BlockSpec((tm, 1), lambda i, j, k: (i, 0)))
    if col_scale is not None:
        inputs.append(col_scale)
        in_specs.append(pl.BlockSpec((1, tk), lambda i, j, k: (0, k)))
    if col_bias is not None:
        inputs.append(col_bias)
        in_specs.append(pl.BlockSpec((1, tk), lambda i, j, k: (0, k)))
    if gate is not None:
        inputs.append(gate)   # shape (1,) f32, lives in SMEM
        in_specs.append(pl.BlockSpec(memory_space=pltpu.MemorySpace.SMEM))
    if residual is not None:
        inputs.append(residual)
        in_specs.append(pl.BlockSpec((tm, tn), lambda i, j, k: (i, j)))

    scratch = [pltpu.VMEM((tm, tn), jnp.float32)]
    if has_rms:
        scratch.append(pltpu.VMEM((tm, 1), jnp.float32))

    kernel = functools.partial(
        _fused_matmul_kernel, nk=nk, kdim=kdim, rms_eps=rms_eps,
        has_rms=has_rms, has_shift=x_shift is not None, has_xscale=x_scale is not None,
        has_colscale=col_scale is not None, has_colbias=col_bias is not None,
        has_gate=gate is not None, has_residual=residual is not None)

    return pl.pallas_call(
        kernel,
        out_shape=jax.ShapeDtypeStruct((n, dout), out_dtype),
        grid=(n // tm, dout // tn, nk),
        in_specs=in_specs,
        out_specs=pl.BlockSpec((tm, tn), lambda i, j, k: (i, j)),
        scratch_shapes=scratch,
        compiler_params=pltpu.CompilerParams(
            dimension_semantics=("parallel", "parallel", "arbitrary"),
            vmem_limit_bytes=_VMEM_LIMIT),
    )(*inputs)


# ---------------------------------------------------------------------------
# Llama MLP: down( silu(gate(rmsnorm(x))) * up(rmsnorm(x)) ) + x
#   RMSNorm computed in-kernel at j==0 into a cached bf16 xn scratch; residual reuses x_ref.
# ---------------------------------------------------------------------------

def _glu_mlp_kernel(x_ref, gamma_ref, wg_ref, wu_ref, wd_ref, o_ref,
                    acc_ref, xn_ref, *, ni, eps):
    j = pl.program_id(1)

    @pl.when(j == 0)
    def _():
        acc_ref[...] = jnp.zeros_like(acc_ref)
        xf = x_ref[...].astype(jnp.float32)
        rstd = jax.lax.rsqrt(jnp.mean(xf * xf, axis=-1, keepdims=True) + eps)
        xn_ref[...] = (xf * rstd * gamma_ref[...].astype(jnp.float32)).astype(xn_ref.dtype)

    xn = xn_ref[...]
    g = jnp.dot(xn, wg_ref[...], preferred_element_type=jnp.float32)
    u = jnp.dot(xn, wu_ref[...], preferred_element_type=jnp.float32)
    hmid = (jax.nn.silu(g) * u).astype(xn.dtype)
    acc_ref[...] += jnp.dot(hmid, wd_ref[...], preferred_element_type=jnp.float32)

    @pl.when(j == ni - 1)
    def _():
        o_ref[...] = (acc_ref[...] + x_ref[...].astype(jnp.float32)).astype(o_ref.dtype)


def glu_mlp(x, gamma, wg, wu, wd, *, eps):
    n, d = x.shape
    i_dim = wg.shape[1]
    tm = _pick_tile(n, _MLP_ROW_TILES)
    ti = _pick_tile(i_dim, _MLP_I_TILES)
    ni = i_dim // ti
    return pl.pallas_call(
        functools.partial(_glu_mlp_kernel, ni=ni, eps=eps),
        out_shape=jax.ShapeDtypeStruct((n, d), x.dtype),
        grid=(n // tm, ni),
        in_specs=[pl.BlockSpec((tm, d), lambda i, j: (i, 0)),
                  pl.BlockSpec((1, d), lambda i, j: (0, 0)),
                  pl.BlockSpec((d, ti), lambda i, j: (0, j)),
                  pl.BlockSpec((d, ti), lambda i, j: (0, j)),
                  pl.BlockSpec((ti, d), lambda i, j: (j, 0))],
        out_specs=pl.BlockSpec((tm, d), lambda i, j: (i, 0)),
        scratch_shapes=[pltpu.VMEM((tm, d), jnp.float32),
                        pltpu.VMEM((tm, d), x.dtype)],
        compiler_params=pltpu.CompilerParams(
            dimension_semantics=("parallel", "arbitrary"),
            vmem_limit_bytes=_VMEM_LIMIT),
    )(x, gamma, wg, wu, wd)


# ---------------------------------------------------------------------------
# Flamingo FeedForward: W2(silu(W1(LN(x)))) * tanh(gate) + x
#   LayerNorm computed in-kernel at j==0; residual reuses x_ref.
# ---------------------------------------------------------------------------

def _ff_kernel(x_ref, gamma_ref, beta_ref, w1_ref, w2_ref, gate_ref, o_ref,
               acc_ref, xn_ref, *, ni, eps):
    j = pl.program_id(1)

    @pl.when(j == 0)
    def _():
        acc_ref[...] = jnp.zeros_like(acc_ref)
        xf = x_ref[...].astype(jnp.float32)
        mu = jnp.mean(xf, axis=-1, keepdims=True)
        var = jnp.mean((xf - mu) ** 2, axis=-1, keepdims=True)
        rstd = jax.lax.rsqrt(var + eps)
        xn_ref[...] = ((xf - mu) * rstd * gamma_ref[...].astype(jnp.float32)
                       + beta_ref[...].astype(jnp.float32)).astype(xn_ref.dtype)

    h1 = jax.nn.silu(jnp.dot(xn_ref[...], w1_ref[...],
                             preferred_element_type=jnp.float32)).astype(xn_ref.dtype)
    acc_ref[...] += jnp.dot(h1, w2_ref[...], preferred_element_type=jnp.float32)

    @pl.when(j == ni - 1)
    def _():
        o_ref[...] = (acc_ref[...] * gate_ref[0]
                      + x_ref[...].astype(jnp.float32)).astype(o_ref.dtype)


def ff_block(x, gamma, beta, w1, w2, gate, *, eps=1e-5):
    n, d = x.shape
    i_dim = w1.shape[1]
    tm = _pick_tile(n, _MLP_ROW_TILES)
    ti = _pick_tile(i_dim, _MLP_I_TILES)
    ni = i_dim // ti
    return pl.pallas_call(
        functools.partial(_ff_kernel, ni=ni, eps=eps),
        out_shape=jax.ShapeDtypeStruct((n, d), x.dtype),
        grid=(n // tm, ni),
        in_specs=[pl.BlockSpec((tm, d), lambda i, j: (i, 0)),
                  pl.BlockSpec((1, d), lambda i, j: (0, 0)),
                  pl.BlockSpec((1, d), lambda i, j: (0, 0)),
                  pl.BlockSpec((d, ti), lambda i, j: (0, j)),
                  pl.BlockSpec((ti, d), lambda i, j: (j, 0)),
                  pl.BlockSpec(memory_space=pltpu.MemorySpace.SMEM)],
        out_specs=pl.BlockSpec((tm, d), lambda i, j: (i, 0)),
        scratch_shapes=[pltpu.VMEM((tm, d), jnp.float32),
                        pltpu.VMEM((tm, d), x.dtype)],
        compiler_params=pltpu.CompilerParams(
            dimension_semantics=("parallel", "arbitrary"),
            vmem_limit_bytes=_VMEM_LIMIT),
    )(x, gamma, beta, w1, w2, gate)


# ---------------------------------------------------------------------------
# Flash attention, reading Q/K/V directly from the fused projection layout
# (B*S, n_heads_total*dh) via a head grid axis; RoPE fused in the prologue;
# bf16 QK^T / PV matmuls; causal KV tiles above the diagonal are skipped.
# NOTE: head_dim must be a multiple of 128 (true for real Llama and the test below).
# ---------------------------------------------------------------------------

def _rope_rotate(x, cos, sin_signed):
    # out = x*cos + rotate_half(x)*sin ; the rotate_half sign is folded into sin_signed,
    # so the rotation is a pure lane roll (XLU slot, nearly free).
    xf = x.astype(jnp.float32)
    dh = x.shape[-1]
    return xf * cos + pltpu.roll(xf, shift=dh // 2, axis=1) * sin_signed


def _flash_attn_kernel(*refs, causal, has_rope, tq, tk, nk):
    it = iter(refs)
    q_ref = next(it)
    k_ref = next(it)
    v_ref = next(it)
    if has_rope:
        cq_ref = next(it)
        sq_ref = next(it)
        ck_ref = next(it)
        sk_ref = next(it)
    o_ref = next(it)
    m_ref = next(it)
    l_ref = next(it)
    acc_ref = next(it)

    qi = pl.program_id(2)
    ki = pl.program_id(3)

    @pl.when(ki == 0)
    def _():
        m_ref[...] = jnp.full_like(m_ref, -1e30)
        l_ref[...] = jnp.zeros_like(l_ref)
        acc_ref[...] = jnp.zeros_like(acc_ref)

    def _process():
        q = q_ref[...]
        k = k_ref[...]
        if has_rope:
            q = _rope_rotate(q, cq_ref[...], sq_ref[...]).astype(q_ref.dtype)
            k = _rope_rotate(k, ck_ref[...], sk_ref[...]).astype(k_ref.dtype)
        # bf16 MXU matmul, f32 accumulation; attention scale pre-folded into Q weights.
        s = jax.lax.dot_general(q, k, (((1,), (1,)), ((), ())),
                                preferred_element_type=jnp.float32)     # (tq, tk)
        if causal:
            qpos = qi * tq + jax.lax.broadcasted_iota(jnp.int32, s.shape, 0)
            kpos = ki * tk + jax.lax.broadcasted_iota(jnp.int32, s.shape, 1)
            s = jnp.where(kpos > qpos, -1e30, s)
        m_prev = m_ref[...]
        m_new = jnp.maximum(m_prev, jnp.max(s, axis=-1, keepdims=True))
        a = jnp.exp(m_prev - m_new)
        p = jnp.exp(s - m_new)
        l_ref[...] = a * l_ref[...] + jnp.sum(p, axis=-1, keepdims=True)
        acc_ref[...] = a * acc_ref[...] + jnp.dot(p.astype(v_ref.dtype), v_ref[...],
                                                  preferred_element_type=jnp.float32)
        m_ref[...] = m_new

    if causal:
        # Skip KV tiles entirely above the causal diagonal (~2x fewer attention FLOPs).
        @pl.when(ki * tk <= qi * tq + tq - 1)
        def _():
            _process()
    else:
        _process()

    @pl.when(ki == nk - 1)
    def _():
        o_ref[...] = (acc_ref[...] * pl.reciprocal(l_ref[...], approx=True)
                      ).astype(o_ref.dtype)


def flash_attention(q_src, k_src, v_src, *, B, Sq, Skv, H, dh, causal,
                    q_head0, k_head0, v_head0, cos=None, sin=None, out_dtype=BF16):
    tq = _pick_tile(Sq, _ATTN_TILES)
    tk = _pick_tile(Skv, _ATTN_TILES)
    nq = Sq // tq
    nk = Skv // tk
    has_rope = cos is not None

    inputs = [q_src, k_src, v_src]
    in_specs = [
        pl.BlockSpec((tq, dh), lambda b, h, qi, ki: (b * nq + qi, q_head0 + h)),
        pl.BlockSpec((tk, dh), lambda b, h, qi, ki: (b * nk + ki, k_head0 + h)),
        pl.BlockSpec((tk, dh), lambda b, h, qi, ki: (b * nk + ki, v_head0 + h)),
    ]
    if has_rope:
        inputs += [cos, sin, cos, sin]
        in_specs += [
            pl.BlockSpec((tq, dh), lambda b, h, qi, ki: (qi, 0)),
            pl.BlockSpec((tq, dh), lambda b, h, qi, ki: (qi, 0)),
            pl.BlockSpec((tk, dh), lambda b, h, qi, ki: (ki, 0)),
            pl.BlockSpec((tk, dh), lambda b, h, qi, ki: (ki, 0)),
        ]

    kernel = functools.partial(_flash_attn_kernel, causal=causal, has_rope=has_rope,
                               tq=tq, tk=tk, nk=nk)
    return pl.pallas_call(
        kernel,
        out_shape=jax.ShapeDtypeStruct((B * Sq, H * dh), out_dtype),
        grid=(B, H, nq, nk),
        in_specs=in_specs,
        out_specs=pl.BlockSpec((tq, dh), lambda b, h, qi, ki: (b * nq + qi, h)),
        scratch_shapes=[pltpu.VMEM((tq, 1), jnp.float32),
                        pltpu.VMEM((tq, 1), jnp.float32),
                        pltpu.VMEM((tq, dh), jnp.float32)],
        compiler_params=pltpu.CompilerParams(
            dimension_semantics=("parallel", "parallel", "parallel", "arbitrary")),
    )(*inputs)


# ---------------------------------------------------------------------------
# Fused final-RMSNorm + LM head + cross-entropy (online logsumexp over vocab tiles).
# Emits the f32 logits (module contract) and a per-row loss vector reduced in JAX.
# Row-tile axis is "parallel" (megacore shardable); normalized xn tile is cached.
# ---------------------------------------------------------------------------

def _lm_head_ce_kernel(x_ref, gamma_ref, w_ref, tgt_ref, logits_ref, loss_ref,
                       xn_ref, m_ref, l_ref, p_ref, *, nv, tv, eps):
    j = pl.program_id(1)

    @pl.when(j == 0)
    def _():
        xf = x_ref[...].astype(jnp.float32)
        rstd = jax.lax.rsqrt(jnp.mean(xf * xf, axis=-1, keepdims=True) + eps)
        xn_ref[...] = (xf * rstd * gamma_ref[...].astype(jnp.float32)).astype(xn_ref.dtype)
        m_ref[...] = jnp.full_like(m_ref, -1e30)
        l_ref[...] = jnp.zeros_like(l_ref)
        p_ref[...] = jnp.zeros_like(p_ref)

    logits = jnp.dot(xn_ref[...], w_ref[...], preferred_element_type=jnp.float32)
    logits_ref[...] = logits

    # online logsumexp
    m_new = jnp.maximum(m_ref[...], jnp.max(logits, axis=-1, keepdims=True))
    l_ref[...] = l_ref[...] * jnp.exp(m_ref[...] - m_new) + jnp.sum(
        jnp.exp(logits - m_new), axis=-1, keepdims=True)
    m_ref[...] = m_new

    # picked-label logit (target < 0 => ignored row)
    cols = j * tv + jax.lax.broadcasted_iota(jnp.int32, logits.shape, 1)
    tgt = tgt_ref[...]
    p_ref[...] += jnp.sum(jnp.where(cols == tgt, logits, 0.0), axis=-1, keepdims=True)

    @pl.when(j == nv - 1)
    def _():
        lse = m_ref[...] + jnp.log(l_ref[...])
        loss_ref[...] = jnp.where(tgt >= 0, lse - p_ref[...], 0.0)


def lm_head_with_loss(h2, gamma, w_lm, targets, *, eps):
    n, d = h2.shape
    v = w_lm.shape[1]
    tm = _pick_tile(n, _ROW_TILES)
    tv = _pick_tile(v, _COL_TILES)
    nv = v // tv
    return pl.pallas_call(
        functools.partial(_lm_head_ce_kernel, nv=nv, tv=tv, eps=eps),
        out_shape=(jax.ShapeDtypeStruct((n, v), jnp.float32),
                   jax.ShapeDtypeStruct((n, 1), jnp.float32)),
        grid=(n // tm, nv),
        in_specs=[pl.BlockSpec((tm, d), lambda i, j: (i, 0)),
                  pl.BlockSpec((1, d), lambda i, j: (0, 0)),
                  pl.BlockSpec((d, tv), lambda i, j: (0, j)),
                  pl.BlockSpec((tm, 1), lambda i, j: (i, 0))],
        out_specs=(pl.BlockSpec((tm, tv), lambda i, j: (i, j)),
                   pl.BlockSpec((tm, 1), lambda i, j: (i, 0))),
        scratch_shapes=[pltpu.VMEM((tm, d), h2.dtype),
                        pltpu.VMEM((tm, 1), jnp.float32),
                        pltpu.VMEM((tm, 1), jnp.float32),
                        pltpu.VMEM((tm, 1), jnp.float32)],
        compiler_params=pltpu.CompilerParams(
            dimension_semantics=("parallel", "arbitrary"),
            vmem_limit_bytes=_VMEM_LIMIT),
    )(h2, gamma, w_lm, targets)


# ---------------------------------------------------------------------------
# Plain-JAX glue (RoPE tables, layer composition)
# ---------------------------------------------------------------------------

def rope_cos_sin(seq, dh, theta=10000.0):
    inv_freq = 1.0 / (theta ** (jnp.arange(0, dh, 2, dtype=jnp.float32) / dh))
    t = jnp.arange(seq, dtype=jnp.float32)
    freqs = jnp.einsum("i,j->ij", t, inv_freq)
    emb = jnp.concatenate([freqs, freqs], axis=-1)        # (S, dh)
    cos = jnp.cos(emb)
    sin = jnp.sin(emb)
    half = jnp.ones((1, dh // 2), jnp.float32)
    sign = jnp.concatenate([-half, half], axis=-1)        # rotate_half sign folded into sin
    return cos, sin * sign


def llama_decoder_layer(h2, p, cos, sin, cfg, B, S):
    H, dh = cfg["heads"], cfg["head_dim"]
    # QKV projection with fused RMSNorm prologue (1/sqrt(dh) pre-folded into Q columns)
    qkv = fused_matmul(h2, p["wqkv"], rms_gamma=p["input_ln"], rms_eps=cfg["rms_eps"])
    attn = flash_attention(qkv, qkv, qkv, B=B, Sq=S, Skv=S, H=H, dh=dh, causal=True,
                           q_head0=0, k_head0=H, v_head0=2 * H, cos=cos, sin=sin,
                           out_dtype=h2.dtype)
    h2 = fused_matmul(attn, p["wo"], residual=h2)          # residual fused
    h2 = glu_mlp(h2, p["post_ln"], p["w_gate"], p["w_up"], p["w_down"],
                 eps=cfg["rms_eps"])                       # RMSNorm + residual fused
    return h2


def gated_xattn_block(x2, media2, p, cfg, B, S, M):
    H, dh = cfg["heads"], cfg["head_dim"]
    # MaskedCrossAttention (LayerNorm fused into the to_q prologue; scale folded into to_q)
    mu, rstd = ln_stats(x2, eps=1e-5)
    q = fused_matmul(x2, p["to_q"], x_shift=mu, x_scale=rstd,
                     col_scale=p["attn_norm_w"], col_bias=p["attn_norm_b"])
    kv = fused_matmul(media2, p["to_kv"])
    out = flash_attention(q, kv, kv, B=B, Sq=S, Skv=M, H=H, dh=dh, causal=False,
                          q_head0=0, k_head0=0, v_head0=H, out_dtype=x2.dtype)
    attn_gate = jnp.tanh(p["attn_gate"]).astype(jnp.float32)      # (1,)
    x2 = fused_matmul(out, p["to_out"], gate=attn_gate, residual=x2)
    # FeedForward (LayerNorm prologue + gate/residual epilogue fused)
    ff_gate = jnp.tanh(p["ff_gate"]).astype(jnp.float32)          # (1,)
    x2 = ff_block(x2, p["ff_norm_w"], p["ff_norm_b"], p["ff_w1"], p["ff_w2"], ff_gate)
    return x2


def custom_llama_forward(params, input_ids, soft_prompt, labels, cfg):
    B, S = input_ids.shape
    D = cfg["hidden"]
    # TODO(synk): token-embedding gather kept in plain JAX (no clean Pallas tile-gather here)
    h2 = params["embed"][input_ids].reshape(B * S, D)
    cos, sin = rope_cos_sin(S, cfg["head_dim"], cfg["rope_theta"])

    media2 = None
    M = 0
    if soft_prompt is not None:
        M = soft_prompt.shape[1]
        media2 = soft_prompt.reshape(B * M, D)

    i_x = 0
    for i in range(cfg["n_layers"]):
        if i in cfg["arr"] and soft_prompt is not None:
            h2 = gated_xattn_block(h2, media2, params["xattn"][i_x], cfg, B, S, M)
            i_x += 1
        h2 = llama_decoder_layer(h2, params["layers"][i], cos, sin, cfg, B, S)

    if labels is None:
        logits2 = fused_matmul(h2, params["lm_head"], rms_gamma=params["final_norm"],
                               rms_eps=cfg["rms_eps"], out_dtype=jnp.float32)
        return None, logits2.reshape(B, S, cfg["vocab"])

    # shifted targets: row (b, s) predicts labels[b, s+1]; last position / negative labels ignored
    flat_labels = labels.reshape(-1).astype(jnp.int32)
    targets = jnp.where((jnp.arange(B * S) % S) == S - 1,
                        -1, jnp.roll(flat_labels, -1)).reshape(B * S, 1)
    logits2, row_loss = lm_head_with_loss(h2, params["final_norm"], params["lm_head"],
                                          targets, eps=cfg["rms_eps"])
    valid = jnp.maximum(jnp.sum(targets >= 0), 1).astype(jnp.float32)
    loss = jnp.sum(row_loss) / valid
    return loss, logits2.reshape(B, S, cfg["vocab"])


# ---------------------------------------------------------------------------
# Deterministic parameter init (synthetic — no checkpoint load).
# Weights stored pre-transposed as [Din, Dout]; QKV fused along Dout; the attention
# scale 1/sqrt(dh) is folded into the Q columns of wqkv / into to_q.
# ---------------------------------------------------------------------------

def init_params(key, cfg):
    D, H, dh = cfg["hidden"], cfg["heads"], cfg["head_dim"]
    I, V, L = cfg["intermediate"], cfg["vocab"], cfg["n_layers"]
    inner = H * dh
    att_scale = 1.0 / math.sqrt(dh)
    cnt = [0]

    def w32(shape, scale=0.02):
        cnt[0] += 1
        k = jax.random.fold_in(key, cnt[0])
        return scale * jax.random.normal(k, shape, jnp.float32)

    params = {
        "embed": w32((V, D)).astype(BF16),
        "lm_head": w32((D, V)).astype(BF16),
        "final_norm": jnp.ones((1, D), BF16),
        "layers": [],
        "xattn": [],
    }
    for _ in range(L):
        wq = w32((D, inner)) * att_scale        # scale folded into Q projection
        wk = w32((D, inner))
        wv = w32((D, inner))
        params["layers"].append({
            "input_ln": jnp.ones((1, D), BF16),
            "wqkv": jnp.concatenate([wq, wk, wv], axis=1).astype(BF16),
            "wo": w32((inner, D)).astype(BF16),
            "post_ln": jnp.ones((1, D), BF16),
            "w_gate": w32((D, I)).astype(BF16),
            "w_up": w32((D, I)).astype(BF16),
            "w_down": w32((I, D)).astype(BF16),
        })
    for _ in range(len(cfg["arr"])):
        params["xattn"].append({
            "attn_norm_w": jnp.ones((1, D), BF16),
            "attn_norm_b": jnp.zeros((1, D), BF16),
            "to_q": (w32((D, inner)) * att_scale).astype(BF16),   # scale folded in
            "to_kv": w32((D, 2 * inner)).astype(BF16),
            "to_out": w32((inner, D)).astype(BF16),
            "attn_gate": jnp.zeros((1,), jnp.float32),
            "ff_norm_w": jnp.ones((1, D), BF16),
            "ff_norm_b": jnp.zeros((1, D), BF16),
            "ff_w1": w32((D, I)).astype(BF16),
            "ff_w2": w32((I, D)).astype(BF16),
            "ff_gate": jnp.zeros((1,), jnp.float32),
        })
    return params


if __name__ == "__main__":
    # head_dim=128 so the per-head column blocks in the flash kernel are lane-aligned
    # (same as real Llama); everything else kept small.
    cfg = dict(hidden=256, heads=2, head_dim=128, intermediate=512, vocab=512,
               n_layers=2, arr=(0,), rope_theta=10000.0, rms_eps=1e-6)
    key = jax.random.PRNGKey(0)
    params = init_params(key, cfg)

    B, S, M = 2, 16, 16
    kid, ksp = jax.random.split(jax.random.fold_in(key, 12345))
    input_ids = jax.random.randint(kid, (B, S), 0, cfg["vocab"], dtype=jnp.int32)
    soft_prompt = (0.02 * jax.random.normal(ksp, (B, M, cfg["hidden"]),
                                            jnp.float32)).astype(BF16)
    labels = input_ids

    loss, logits = custom_llama_forward(params, input_ids, soft_prompt, labels, cfg)
    jax.block_until_ready((loss, logits))
    assert logits.shape == (B, S, cfg["vocab"]) and logits.dtype == jnp.float32
    assert loss.shape == () and loss.dtype == jnp.float32
    assert bool(jnp.isfinite(loss))
    print("KERNEL_OK")
</pallas_src>

<mosaic_0001>
module attributes {stable_mosaic.version = 11 : i64} {
  func.func @_ln_stats_kernel(%arg0: i32, %arg1: memref<32x256xbf16, #tpu.memory_space<vmem>>, %arg2: memref<32x1xf32, #tpu.memory_space<vmem>>, %arg3: memref<32x1xf32, #tpu.memory_space<vmem>>) attributes {dimension_semantics = [#tpu.dimension_semantics<parallel>], iteration_bounds = array<i64: 1>, scalar_prefetch = 0 : i64, scratch_operands = 0 : i64, tpu.core_type = #tpu.core_type<tc>, window_params = [{transform_indices = @transform_0, window_bounds = array<i64: 32, 256>}, {transform_indices = @transform_1, window_bounds = array<i64: 32, 1>}, {transform_indices = @transform_2, window_bounds = array<i64: 32, 1>}]} {
    %c0 = arith.constant 0 : index
    %c0_0 = arith.constant 0 : index
    %0 = vector.load %arg1[%c0, %c0_0] : memref<32x256xbf16, #tpu.memory_space<vmem>>, vector<32x256xbf16>
    %1 = arith.extf %0 : vector<32x256xbf16> to vector<32x256xf32>
    %cst = arith.constant dense<0.000000e+00> : vector<32xf32>
    %2 = vector.multi_reduction <add>, %1, %cst [1] : vector<32x256xf32> to vector<32xf32>
    %3 = vector.shape_cast %2 : vector<32xf32> to vector<32x1xf32>
    %cst_1 = arith.constant 2.560000e+02 : f32
    %4 = vector.broadcast %cst_1 : f32 to vector<32x1xf32>
    %5 = arith.divf %3, %4 : vector<32x1xf32>
    %6 = vector.broadcast %5 : vector<32x1xf32> to vector<32x256xf32>
    %7 = arith.subf %1, %6 : vector<32x256xf32>
    %8 = arith.mulf %7, %7 : vector<32x256xf32>
    %cst_2 = arith.constant dense<0.000000e+00> : vector<32xf32>
    %9 = vector.multi_reduction <add>, %8, %cst_2 [1] : vector<32x256xf32> to vector<32xf32>
    %10 = vector.shape_cast %9 : vector<32xf32> to vector<32x1xf32>
    %cst_3 = arith.constant 2.560000e+02 : f32
    %11 = vector.broadcast %cst_3 : f32 to vector<32x1xf32>
    %12 = arith.divf %10, %11 : vector<32x1xf32>
    %c0_4 = arith.constant 0 : index
    %c0_5 = arith.constant 0 : index
    %13 = vector.load %arg2[%c0_4, %c0_5] : memref<32x1xf32, #tpu.memory_space<vmem>>, vector<32x1xf32>
    tpu.vector_store %arg2[%c0_4, %c0_5], %5 {strides = array<i32>} : memref<32x1xf32, #tpu.memory_space<vmem>>, vector<32x1xf32>,
    %cst_6 = arith.constant 9.99999974E-6 : f32
    %14 = vector.broadcast %cst_6 : f32 to vector<32x1xf32>
    %15 = arith.addf %12, %14 : vector<32x1xf32>
    %16 = math.rsqrt %15 : vector<32x1xf32>
    %c0_7 = arith.constant 0 : index
    %c0_8 = arith.constant 0 : index
    %17 = vector.load %arg3[%c0_7, %c0_8] : memref<32x1xf32, #tpu.memory_space<vmem>>, vector<32x1xf32>
    tpu.vector_store %arg3[%c0_7, %c0_8], %16 {strides = array<i32>} : memref<32x1xf32, #tpu.memory_space<vmem>>, vector<32x1xf32>,
    return
  }
  func.func @transform_0(%arg0: i32) -> (i32, i32) {
    %c0_i32 = arith.constant 0 : i32
    %c0_i32_0 = arith.constant 0 : i32
    return %arg0, %c0_i32 : i32, i32
  }
  func.func @transform_1(%arg0: i32) -> (i32, i32) {
    %c0_i32 = arith.constant 0 : i32
    %c0_i32_0 = arith.constant 0 : i32
    return %arg0, %c0_i32 : i32, i32
  }
  func.func @transform_2(%arg0: i32) -> (i32, i32) {
    %c0_i32 = arith.constant 0 : i32
    %c0_i32_0 = arith.constant 0 : i32
    return %arg0, %c0_i32 : i32, i32
  }
}

</mosaic_0001>

<bundles_post_ra>
// kernel: tpu_custom_call.1
= control target key start
LH: loop header
LB: loop body
LE: loop exit
PB: predicated region body
PF: predicated region fallthrough
CT: control target
= control target key end

     0   :  { %8 = vsyncpa [#allocation3], 0  ;;  %s146_s9 = smov [#allocation2]   ;;  %s208_s0 = inlined_call_operand.hbm [shape: bf16[32,256], index: 0, kind: input, shape index: {}]   ;;  %s209_s1 = inlined_call_operand.vmem [shape: f32[32,1], index: 1, kind: output, shape index: {0}]   ;;  %s210_s2 = inlined_call_operand.vmem [shape: f32[32,1], index: 2, kind: output, shape index: {1}]  }
   0x1   :  { %s14_s10 = sshll.u32 %s146_s9, 4  ;;  %s122_s13 = scalar_lea.hbm %s208_s0, 512  ;;  %s15_s10 = int_to_ptr.vmem [resolvable:$true] %s14_s10 }
   0x2   :  { %p123_p0 = scmp.ne.s32.totalorder %s208_s0, %s122_s13  ;;  %p126_p1 = scmp.lt.u32.totalorder %s122_s13, %s208_s0 }
   0x4   :  { %p128_p2 = pnand %p126_p1, %p123_p0 }
   0x6   :  { %131 = shalt.err (!%p128_p2)
}
   0x7   :  { %s132_s18 = scalar_lea.vmem %s15_s10, 512  ;;  %p137_p4 = scmp.lt.s32.totalorder %s15_s10, %s15_s10 }
   0x8   :  { %p133_p3 = scmp.ne.s32.totalorder %s15_s10, %s132_s18  ;;  %p138_p5 = scmp.lt.s32.totalorder %s132_s18, %s132_s18 }
   0xa   :  { %p139_p6 = por %p138_p5, %p137_p4 }
   0xc   :  { %p140_p7 = pnand %p139_p6, %p133_p3 }
   0xe   :  { %143 = shalt.err (!%p140_p7)
}
   0xf   :  { %s147_s19 = smov 128   ;;  %s148_s20 = smov 8  }
  0x10   :  { %20 = dma.hbm_to_vmem [thread:$0]  %s208_s0, 512, %s15_s10, [#allocation3], %s147_s19, %s147_s19, %s148_s20  }
  0x11   :  { %144 = dma.done.wait [#allocation3], 512  }
  0x12   :  { %145 = vsyncadd [#allocation3], 4294966784  ;;  %v24_v0 = vld [vmem:[#allocation2] sm:$0xff]  ;;  %v26_v1 = vld [vmem:[#allocation2 + $0x10] sm:$0xff]  ;;  %vm85_vm0 = vcmask 7168  }
  0x13   :  { %v25_v2 = vld [vmem:[#allocation2 + $0x8] sm:$0xff]  ;;  %v28_v3 = vunpack.c.l.bf16 %v24_v0  ;;  %v29_v4 = vunpack.c.h.bf16 %v24_v0  ;;  %v32_v5 = vunpack.c.l.bf16 %v26_v1  ;;  %v33_v6 = vunpack.c.h.bf16 %v26_v1  ;;  %v27_v7 = vld [vmem:[#allocation2 + $0x18] sm:$0xff] }
  0x14   :  { %v30_v8 = vunpack.c.l.bf16 %v25_v2  ;;  %v31_v9 = vunpack.c.h.bf16 %v25_v2  ;;  %v34_v10 = vunpack.c.l.bf16 %v27_v7  ;;  %v35_v11 = vunpack.c.h.bf16 %v27_v7 }
  0x15   :  { %v36_v12 = vadd.f32 %v29_v4, %v28_v3  ;;  %v42_v13 = vadd.f32 %v33_v6, %v32_v5 }
  0x16   :  { %v39_v14 = vadd.f32 %v31_v9, %v30_v8  ;;  %v45_v15 = vadd.f32 %v35_v11, %v34_v10 }
  0x17   :  { %37 = vadd.xlane.f32.xlu0 %v36_v12  ;;  %43 = vadd.xlane.f32.xlu1 %v42_v13 }
  0x1b   :  { %40 = vadd.xlane.f32.xlu0 %v39_v14  ;;  %46 = vadd.xlane.f32.xlu1 %v45_v15 }
  0xa4   :  { %v38_v16 = vpop.xlane.xlu0 %37  ;;  %v44_v17 = vpop.xlane.xlu1 %43 }
  0xa5   :  { %v49_v18 = vmul.f32 0.00390625, %v38_v16  ;;  %v51_v19 = vmul.f32 0.00390625, %v44_v17 }
  0xa7   :  { %86 = vst.msk [vmem:[%s209_s1] sm:$0xff] %vm85_vm0, %v49_v18  ;;  %88 = vst.msk [vmem:[%s209_s1 + $0x10] sm:$0xff] %vm85_vm0, %v51_v19  ;;  %v53_v20 = vsub.f32 %v28_v3, %v49_v18  ;;  %v54_v21 = vsub.f32 %v29_v4, %v49_v18  ;;  %v57_v22 = vsub.f32 %v32_v5, %v51_v19 }
  0xa8   :  { %v58_v23 = vsub.f32 %v33_v6, %v51_v19  ;;  %v41_v24 = vpop.xlane.xlu0 %40  ;;  %v47_v25 = vpop.xlane.xlu1 %46 }
  0xa9   :  { %v50_v26 = vmul.f32 0.00390625, %v41_v24  ;;  %v52_v27 = vmul.f32 0.00390625, %v47_v25  ;;  %v61_v28 = vmul.f32 %v53_v20, %v53_v20  ;;  %v62_v29 = vmul.f32 %v54_v21, %v54_v21 }
  0xaa   :  { %v65_v30 = vmul.f32 %v57_v22, %v57_v22  ;;  %v66_v31 = vmul.f32 %v58_v23, %v58_v23 }
  0xab   :  { %87 = vst.msk [vmem:[%s209_s1 + $0x8] sm:$0xff] %vm85_vm0, %v50_v26  ;;  %89 = vst.msk [vmem:[%s209_s1 + $0x18] sm:$0xff] %vm85_vm0, %v52_v27  ;;  %v69_v32 = vadd.f32 %v62_v29, %v61_v28  ;;  %v55_v33 = vsub.f32 %v30_v8, %v50_v26  ;;  %v56_v34 = vsub.f32 %v31_v9, %v50_v26 }
  0xac   :  { %v59_v35 = vsub.f32 %v34_v10, %v52_v27  ;;  %v60_v36 = vsub.f32 %v35_v11, %v52_v27  ;;  %v75_v37 = vadd.f32 %v66_v31, %v65_v30 }
  0xad   :  { %70 = vadd.xlane.f32.xlu0 %v69_v32  ;;  %v63_v38 = vmul.f32 %v55_v33, %v55_v33  ;;  %v64_v39 = vmul.f32 %v56_v34, %v56_v34 }
  0xae   :  { %v67_v40 = vmul.f32 %v59_v35, %v59_v35  ;;  %v68_v41 = vmul.f32 %v60_v36, %v60_v36 }
  0xaf   :  { %v72_v42 = vadd.f32 %v64_v39, %v63_v38 }
  0xb0   :  { %v78_v43 = vadd.f32 %v68_v41, %v67_v40 }
  0xb1   :  { %76 = vadd.xlane.f32.xlu0 %v75_v37  ;;  %73 = vadd.xlane.f32.xlu1 %v72_v42 }
  0xb5   :  { %79 = vadd.xlane.f32.xlu1 %v78_v43 }
 0x13a   :  { %v71_v44 = vpop.xlane.xlu0 %70 }
 0x13b   :  { %v81_v45 = vmul.f32 0.00390625, %v71_v44 }
 0x13d   :  { %v90_v46 = vadd.f32 1e-05, %v81_v45 }
 0x13e   :  { %v74_v47 = vpop.xlane.xlu1 %73  ;;  %v77_v48 = vpop.xlane.xlu0 %76 }
 0x13f   :  { %114 = vrsqrt.f32 %v90_v46  ;;  %v82_v49 = vmul.f32 0.00390625, %v74_v47  ;;  %v83_v50 = vmul.f32 0.00390625, %v77_v48 }
 0x141   :  { %v91_v51 = vadd.f32 1e-05, %v82_v49  ;;  %v92_v52 = vadd.f32 1e-05, %v83_v50 }
 0x142   :  { %v80_v53 = vpop.xlane.xlu1 %79 }
 0x143   :  { %116 = vrsqrt.f32 %v91_v51  ;;  %v84_v54 = vmul.f32 0.00390625, %v80_v53 }
 0x144   :  { %118 = vrsqrt.f32 %v92_v52 }
 0x145   :  { %v93_v55 = vadd.f32 1e-05, %v84_v54 }
 0x147   :  { %120 = vrsqrt.f32 %v93_v55 }
 0x149   :  { %v115_v56 = vpop.eup %114 }
 0x14a   :  { %98 = vst.msk [vmem:[%s210_s2] sm:$0xff] %vm85_vm0, %v115_v56 }
 0x14d   :  { %v117_v57 = vpop.eup %116 }
 0x14e   :  { %v119_v58 = vpop.eup %118  ;;  %99 = vst.msk [vmem:[%s210_s2 + $0x8] sm:$0xff] %vm85_vm0, %v117_v57 }
 0x14f   :  { %100 = vst.msk [vmem:[%s210_s2 + $0x10] sm:$0xff] %vm85_vm0, %v119_v58 }
 0x151   :  { %v121_v59 = vpop.eup %120 }
 0x152   :  { %101 = vst.msk [vmem:[%s210_s2 + $0x18] sm:$0xff] %vm85_vm0, %v121_v59 }
 0x153   :  { %110 = vsyncpa [#allocation3], 1 }

</bundles_post_ra>
